<compile_context>
chip_gen: v6e
topology: v6e:2x2x1
jax: 0.10.0
libtpu: 0.0.40
codegen_flags: <defaults>
</compile_context>

<pallas_src>
import jax
import jax.numpy as jnp
from jax.experimental import pallas as pl
from jax.experimental.pallas import tpu as pltpu


def _round_up(x, m):
    return (x + m - 1) // m * m


def _critic_kernel(s_ref, a_ref, w1s_ref, w1a_ref, b1_ref,
                   w2_ref, b2_ref, w3_ref, b3_ref, o_ref):
    # fc1: MXU matmul on the 128-wide state part (bf16 in, f32 accumulate) ...
    h1 = jnp.dot(s_ref[...], w1s_ref[...], preferred_element_type=jnp.float32)
    # ... plus n_actions broadcast FMAs on the VPU for the action columns.
    a = a_ref[...]                                        # [TB, n_actions] f32
    for j in range(a_ref.shape[1]):                       # static, tiny unroll
        h1 = h1 + a[:, j:j + 1] * w1a_ref[j:j + 1, :]
    h1 = jnp.maximum(h1 + b1_ref[...], 0.0)               # bias + ReLU in f32

    # fc2: MXU matmul, bf16 inputs, f32 accumulation.
    h2 = jnp.dot(h1.astype(w2_ref.dtype), w2_ref[...],
                 preferred_element_type=jnp.float32)
    h2 = jnp.maximum(h2 + b2_ref[...], 0.0)

    # fc3 (64 -> 1): VPU multiply + XLU lane reduction instead of an N=1 matmul.
    q = jnp.sum(h2 * w3_ref[...], axis=-1, keepdims=True) + b3_ref[0]
    o_ref[...] = q.astype(o_ref.dtype)


def action_value_forward(state, action, params, *, block_b=512):
    """state: [B, dim_h], action: [B, n_actions] -> q: [B, 1] (float32)."""
    w1s, w1a, b1, w2, b2, w3, b3 = params
    B, dim_h = state.shape
    n_actions = action.shape[1]
    d2 = w2.shape[1]                                      # 64
    assert block_b % 16 == 0

    # Batch tile: multiple of 16 (bf16 sublane packing), capped at block_b.
    tb = min(block_b, _round_up(max(B, 1), 16))
    b_pad = _round_up(B, tb)
    if b_pad != B:
        state = jnp.pad(state, ((0, b_pad - B), (0, 0)))
        action = jnp.pad(action, ((0, b_pad - B), (0, 0)))
    num_tiles = b_pad // tb

    # bf16 for the MXU / halves HBM->VMEM bytes; action stays f32 (VPU path).
    state_bf = state.astype(jnp.bfloat16)
    action_f = action.astype(jnp.float32)
    w1s_bf = w1s.astype(jnp.bfloat16)
    w2_bf = w2.astype(jnp.bfloat16)
    b1f = b1.astype(jnp.float32)
    b2f = b2.astype(jnp.float32)
    w3f = w3.astype(jnp.float32)
    b3f = b3.astype(jnp.float32).reshape(-1)              # flat (1,) SMEM scalar

    flops = 2 * b_pad * ((dim_h + n_actions) * dim_h + dim_h * d2 + d2)
    bytes_accessed = int(
        state_bf.size * 2 + action_f.size * 4 + b_pad * 4
        + w1s_bf.size * 2 + w1a.size * 4 + b1f.size * 4
        + w2_bf.size * 2 + b2f.size * 4 + w3f.size * 4 + 4)

    def resident(shape):  # whole-array block, same block every grid step
        return pl.BlockSpec(shape, lambda i: (0, 0))

    out = pl.pallas_call(
        _critic_kernel,
        out_shape=jax.ShapeDtypeStruct((b_pad, 1), jnp.float32),
        grid=(num_tiles,),
        in_specs=[
            pl.BlockSpec((tb, dim_h), lambda i: (i, 0)),          # state tile (bf16)
            pl.BlockSpec((tb, n_actions), lambda i: (i, 0)),      # action tile (f32)
            resident((dim_h, dim_h)),                             # w1 state part (bf16)
            resident((n_actions, dim_h)),                         # w1 action part (f32)
            resident((1, dim_h)),                                 # b1
            resident((dim_h, d2)),                                # w2 (bf16)
            resident((1, d2)),                                    # b2
            resident((1, d2)),                                    # w3 as a row
            pl.BlockSpec((1,), lambda i: (0,),                    # b3 scalar in SMEM
                         memory_space=pltpu.MemorySpace.SMEM),
        ],
        out_specs=pl.BlockSpec((tb, 1), lambda i: (i, 0)),
        compiler_params=pltpu.CompilerParams(
            dimension_semantics=("parallel",)),
        cost_estimate=pl.CostEstimate(
            flops=flops, transcendentals=0, bytes_accessed=bytes_accessed),
    )(state_bf, action_f, w1s_bf, w1a, b1f, w2_bf, b2f, w3f, b3f)
    return out[:B]


def init_params(key, dim_h, n_actions):
    """PyTorch nn.Linear-style init, stored in the kernel's layout (f32).

    fc1 weight is kept split as (state part [dim_h, dim_h], action part
    [n_actions, dim_h]); all weights are [in, out]; fc3 weight is a [1, 64] row.
    """
    def linear(k, fan_in, fan_out):
        kw, kb = jax.random.split(k)
        bound = 1.0 / jnp.sqrt(float(fan_in))
        w = jax.random.uniform(kw, (fan_in, fan_out), jnp.float32, -bound, bound)
        b = jax.random.uniform(kb, (1, fan_out), jnp.float32, -bound, bound)
        return w, b

    k1, k2, k3 = jax.random.split(key, 3)
    w1, b1 = linear(k1, dim_h + n_actions, dim_h)
    w2, b2 = linear(k2, dim_h, 64)
    w3, b3 = linear(k3, 64, 1)
    return (w1[:dim_h], w1[dim_h:], b1, w2, b2, w3.T, b3)   # w3 stored as [1, 64]


def _reference_forward(state, action, params):
    """Pure-JAX f32 reference matching the PyTorch module."""
    w1s, w1a, b1, w2, b2, w3, b3 = params
    x = jnp.concatenate([state, action], axis=1)
    w1 = jnp.concatenate([w1s, w1a], axis=0)
    h = jnp.maximum(x @ w1 + b1, 0.0)
    h = jnp.maximum(h @ w2 + b2, 0.0)
    return h @ w3.T + b3


# TODO(synk): save_checkpoint / load_checkpoint (torch.save/load of state_dict)
# are host-side file I/O with no Pallas equivalent and are intentionally not ported.

if __name__ == "__main__":
    batch = 2
    dim_h = 128
    n_actions = 4

    key = jax.random.PRNGKey(0)
    k_state, k_action, k_params = jax.random.split(key, 3)

    state = jax.random.normal(k_state, (batch, dim_h), jnp.float32)
    action = jax.random.normal(k_action, (batch, n_actions), jnp.float32)
    params = init_params(k_params, dim_h, n_actions)

    q = jax.block_until_ready(action_value_forward(state, action, params))
    q_ref = _reference_forward(state, action, params)

    assert q.shape == (batch, 1), q.shape
    # bf16 MXU inputs -> relaxed tolerance vs the f32 reference.
    assert jnp.allclose(q, q_ref, atol=5e-2, rtol=5e-2), (q, q_ref)

    print("KERNEL_OK")
</pallas_src>

<mosaic_0001>
module attributes {stable_mosaic.version = 11 : i64} {
  func.func @_critic_kernel(%arg0: i32, %arg1: memref<16x128xbf16, #tpu.memory_space<vmem>>, %arg2: memref<16x4xf32, #tpu.memory_space<vmem>>, %arg3: memref<128x128xbf16, #tpu.memory_space<vmem>>, %arg4: memref<4x128xf32, #tpu.memory_space<vmem>>, %arg5: memref<1x128xf32, #tpu.memory_space<vmem>>, %arg6: memref<128x64xbf16, #tpu.memory_space<vmem>>, %arg7: memref<1x64xf32, #tpu.memory_space<vmem>>, %arg8: memref<1x64xf32, #tpu.memory_space<vmem>>, %arg9: memref<1xf32, #tpu.memory_space<smem>>, %arg10: memref<16x1xf32, #tpu.memory_space<vmem>>) attributes {dimension_semantics = [#tpu.dimension_semantics<parallel>], iteration_bounds = array<i64: 1>, scalar_prefetch = 0 : i64, scratch_operands = 0 : i64, tpu.core_type = #tpu.core_type<tc>, window_params = [{transform_indices = @transform_0, window_bounds = array<i64: 16, 128>}, {transform_indices = @transform_1, window_bounds = array<i64: 16, 4>}, {pipeline_mode = #tpu.pipeline_mode<synchronous>, transform_indices = @transform_2, window_bounds = array<i64: 128, 128>}, {pipeline_mode = #tpu.pipeline_mode<synchronous>, transform_indices = @transform_3, window_bounds = array<i64: 4, 128>}, {pipeline_mode = #tpu.pipeline_mode<synchronous>, transform_indices = @transform_4, window_bounds = array<i64: 1, 128>}, {pipeline_mode = #tpu.pipeline_mode<synchronous>, transform_indices = @transform_5, window_bounds = array<i64: 128, 64>}, {pipeline_mode = #tpu.pipeline_mode<synchronous>, transform_indices = @transform_6, window_bounds = array<i64: 1, 64>}, {pipeline_mode = #tpu.pipeline_mode<synchronous>, transform_indices = @transform_7, window_bounds = array<i64: 1, 64>}, {transform_indices = @transform_8, window_bounds = array<i64: 1>}, {transform_indices = @transform_9, window_bounds = array<i64: 16, 1>}]} {
    %c0 = arith.constant 0 : index
    %c0_0 = arith.constant 0 : index
    %0 = vector.load %arg1[%c0, %c0_0] : memref<16x128xbf16, #tpu.memory_space<vmem>>, vector<16x128xbf16>
    %c0_1 = arith.constant 0 : index
    %c0_2 = arith.constant 0 : index
    %1 = vector.load %arg3[%c0_1, %c0_2] : memref<128x128xbf16, #tpu.memory_space<vmem>>, vector<128x128xbf16>
    %cst = arith.constant dense<0.000000e+00> : vector<16x128xf32>
    %2 = tpu.matmul %0, %1, %cst {dimension_numbers = #tpu.dot_dimension_numbers<[1], [0], [0], [1], [0, 0, 1, 1], [], []>} : vector<16x128xbf16>, vector<128x128xbf16>, vector<16x128xf32> -> vector<16x128xf32>
    %c0_3 = arith.constant 0 : index
    %c0_4 = arith.constant 0 : index
    %3 = vector.load %arg2[%c0_3, %c0_4] : memref<16x4xf32, #tpu.memory_space<vmem>>, vector<16x4xf32>
    %4 = vector.extract_strided_slice %3 {offsets = [0, 0], sizes = [16, 1], strides = [1, 1]} : vector<16x4xf32> to vector<16x1xf32>
    %c0_5 = arith.constant 0 : index
    %c0_6 = arith.constant 0 : index
    %5 = vector.load %arg4[%c0_5, %c0_6] : memref<4x128xf32, #tpu.memory_space<vmem>>, vector<1x128xf32>
    %6 = vector.broadcast %4 : vector<16x1xf32> to vector<16x128xf32>
    %7 = vector.broadcast %5 : vector<1x128xf32> to vector<16x128xf32>
    %8 = arith.mulf %6, %7 : vector<16x128xf32>
    %9 = arith.addf %2, %8 : vector<16x128xf32>
    %10 = vector.extract_strided_slice %3 {offsets = [0, 1], sizes = [16, 1], strides = [1, 1]} : vector<16x4xf32> to vector<16x1xf32>
    %c1 = arith.constant 1 : index
    %c0_7 = arith.constant 0 : index
    %11 = vector.load %arg4[%c1, %c0_7] : memref<4x128xf32, #tpu.memory_space<vmem>>, vector<1x128xf32>
    %12 = vector.broadcast %10 : vector<16x1xf32> to vector<16x128xf32>
    %13 = vector.broadcast %11 : vector<1x128xf32> to vector<16x128xf32>
    %14 = arith.mulf %12, %13 : vector<16x128xf32>
    %15 = arith.addf %9, %14 : vector<16x128xf32>
    %16 = vector.extract_strided_slice %3 {offsets = [0, 2], sizes = [16, 1], strides = [1, 1]} : vector<16x4xf32> to vector<16x1xf32>
    %c2 = arith.constant 2 : index
    %c0_8 = arith.constant 0 : index
    %17 = vector.load %arg4[%c2, %c0_8] : memref<4x128xf32, #tpu.memory_space<vmem>>, vector<1x128xf32>
    %18 = vector.broadcast %16 : vector<16x1xf32> to vector<16x128xf32>
    %19 = vector.broadcast %17 : vector<1x128xf32> to vector<16x128xf32>
    %20 = arith.mulf %18, %19 : vector<16x128xf32>
    %21 = arith.addf %15, %20 : vector<16x128xf32>
    %22 = vector.extract_strided_slice %3 {offsets = [0, 3], sizes = [16, 1], strides = [1, 1]} : vector<16x4xf32> to vector<16x1xf32>
    %c3 = arith.constant 3 : index
    %c0_9 = arith.constant 0 : index
    %23 = vector.load %arg4[%c3, %c0_9] : memref<4x128xf32, #tpu.memory_space<vmem>>, vector<1x128xf32>
    %24 = vector.broadcast %22 : vector<16x1xf32> to vector<16x128xf32>
    %25 = vector.broadcast %23 : vector<1x128xf32> to vector<16x128xf32>
    %26 = arith.mulf %24, %25 : vector<16x128xf32>
    %27 = arith.addf %21, %26 : vector<16x128xf32>
    %c0_10 = arith.constant 0 : index
    %c0_11 = arith.constant 0 : index
    %28 = vector.load %arg5[%c0_10, %c0_11] : memref<1x128xf32, #tpu.memory_space<vmem>>, vector<1x128xf32>
    %29 = vector.broadcast %28 : vector<1x128xf32> to vector<16x128xf32>
    %30 = arith.addf %27, %29 : vector<16x128xf32>
    %cst_12 = arith.constant 0.000000e+00 : f32
    %31 = vector.broadcast %cst_12 : f32 to vector<16x128xf32>
    %32 = arith.maximumf %30, %31 : vector<16x128xf32>
    %33 = arith.truncf %32 : vector<16x128xf32> to vector<16x128xbf16>
    %c0_13 = arith.constant 0 : index
    %c0_14 = arith.constant 0 : index
    %34 = vector.load %arg6[%c0_13, %c0_14] : memref<128x64xbf16, #tpu.memory_space<vmem>>, vector<128x64xbf16>
    %cst_15 = arith.constant dense<0.000000e+00> : vector<16x64xf32>
    %35 = tpu.matmul %33, %34, %cst_15 {dimension_numbers = #tpu.dot_dimension_numbers<[1], [0], [0], [1], [0, 0, 1, 1], [], []>} : vector<16x128xbf16>, vector<128x64xbf16>, vector<16x64xf32> -> vector<16x64xf32>
    %c0_16 = arith.constant 0 : index
    %c0_17 = arith.constant 0 : index
    %36 = vector.load %arg7[%c0_16, %c0_17] : memref<1x64xf32, #tpu.memory_space<vmem>>, vector<1x64xf32>
    %37 = vector.broadcast %36 : vector<1x64xf32> to vector<16x64xf32>
    %38 = arith.addf %35, %37 : vector<16x64xf32>
    %cst_18 = arith.constant 0.000000e+00 : f32
    %39 = vector.broadcast %cst_18 : f32 to vector<16x64xf32>
    %40 = arith.maximumf %38, %39 : vector<16x64xf32>
    %c0_19 = arith.constant 0 : index
    %c0_20 = arith.constant 0 : index
    %41 = vector.load %arg8[%c0_19, %c0_20] : memref<1x64xf32, #tpu.memory_space<vmem>>, vector<1x64xf32>
    %42 = vector.broadcast %41 : vector<1x64xf32> to vector<16x64xf32>
    %43 = arith.mulf %40, %42 : vector<16x64xf32>
    %cst_21 = arith.constant dense<0.000000e+00> : vector<16xf32>
    %44 = vector.multi_reduction <add>, %43, %cst_21 [1] : vector<16x64xf32> to vector<16xf32>
    %45 = vector.shape_cast %44 : vector<16xf32> to vector<16x1xf32>
    %c0_22 = arith.constant 0 : index
    %46 = memref.load %arg9[%c0_22] : memref<1xf32, #tpu.memory_space<smem>>
    %47 = vector.broadcast %46 : f32 to vector<16x1xf32>
    %48 = arith.addf %45, %47 : vector<16x1xf32>
    %c0_23 = arith.constant 0 : index
    %c0_24 = arith.constant 0 : index
    %49 = vector.load %arg10[%c0_23, %c0_24] : memref<16x1xf32, #tpu.memory_space<vmem>>, vector<16x1xf32>
    tpu.vector_store %arg10[%c0_23, %c0_24], %48 {strides = array<i32>} : memref<16x1xf32, #tpu.memory_space<vmem>>, vector<16x1xf32>,
    return
  }
  func.func @transform_0(%arg0: i32) -> (i32, i32) {
    %c0_i32 = arith.constant 0 : i32
    %c0_i32_0 = arith.constant 0 : i32
    return %arg0, %c0_i32 : i32, i32
  }
  func.func @transform_1(%arg0: i32) -> (i32, i32) {
    %c0_i32 = arith.constant 0 : i32
    %c0_i32_0 = arith.constant 0 : i32
    return %arg0, %c0_i32 : i32, i32
  }
  func.func @transform_2(%arg0: i32) -> (i32, i32) {
    %c0_i32 = arith.constant 0 : i32
    %c0_i32_0 = arith.constant 0 : i32
    %c0_i32_1 = arith.constant 0 : i32
    return %c0_i32, %c0_i32_0 : i32, i32
  }
  func.func @transform_3(%arg0: i32) -> (i32, i32) {
    %c0_i32 = arith.constant 0 : i32
    %c0_i32_0 = arith.constant 0 : i32
    %c0_i32_1 = arith.constant 0 : i32
    return %c0_i32, %c0_i32_0 : i32, i32
  }
  func.func @transform_4(%arg0: i32) -> (i32, i32) {
    %c0_i32 = arith.constant 0 : i32
    %c0_i32_0 = arith.constant 0 : i32
    %c0_i32_1 = arith.constant 0 : i32
    return %c0_i32, %c0_i32_0 : i32, i32
  }
  func.func @transform_5(%arg0: i32) -> (i32, i32) {
    %c0_i32 = arith.constant 0 : i32
    %c0_i32_0 = arith.constant 0 : i32
    %c0_i32_1 = arith.constant 0 : i32
    return %c0_i32, %c0_i32_0 : i32, i32
  }
  func.func @transform_6(%arg0: i32) -> (i32, i32) {
    %c0_i32 = arith.constant 0 : i32
    %c0_i32_0 = arith.constant 0 : i32
    %c0_i32_1 = arith.constant 0 : i32
    return %c0_i32, %c0_i32_0 : i32, i32
  }
  func.func @transform_7(%arg0: i32) -> (i32, i32) {
    %c0_i32 = arith.constant 0 : i32
    %c0_i32_0 = arith.constant 0 : i32
    %c0_i32_1 = arith.constant 0 : i32
    return %c0_i32, %c0_i32_0 : i32, i32
  }
  func.func @transform_8(%arg0: i32) -> i32 {
    %c0_i32 = arith.constant 0 : i32
    %c0_i32_0 = arith.constant 0 : i32
    return %c0_i32 : i32
  }
  func.func @transform_9(%arg0: i32) -> (i32, i32) {
    %c0_i32 = arith.constant 0 : i32
    %c0_i32_0 = arith.constant 0 : i32
    return %arg0, %c0_i32 : i32, i32
  }
}

</mosaic_0001>

<bundles_post_ra>
// kernel: tpu_custom_call.1
= control target key start
LH: loop header
LB: loop body
LE: loop exit
PB: predicated region body
PF: predicated region fallthrough
CT: control target
= control target key end

     0   :  { %v481_v0 = vmov 0.0   ;;  %vm482_vm0 = vmmov 0   ;;  %v483_v2 = vmov 1   ;;  %v484_v3 = vmov 0   ;;  %s642_s2 = inlined_call_operand.vmem [shape: bf16[128,128], index: 2, kind: input, shape index: {}]   ;;  %s643_s1 = inlined_call_operand.vmem [shape: f32[16,4], index: 1, kind: input, shape index: {}]   ;;  %s644_s0 = inlined_call_operand.vmem [shape: bf16[16,128], index: 0, kind: input, shape index: {}]   ;;  %s645_s5 = inlined_call_operand.vmem [shape: bf16[128,64], index: 5, kind: input, shape index: {}]   ;;  %s646_s3 = inlined_call_operand.vmem [shape: f32[4,128], index: 3, kind: input, shape index: {}]   ;;  %s647_s4 = inlined_call_operand.vmem [shape: f32[1,128], index: 4, kind: input, shape index: {}]   ;;  %s648_s6 = inlined_call_operand.vmem [shape: f32[1,64], index: 6, kind: input, shape index: {}]   ;;  %s649_s7 = inlined_call_operand.vmem [shape: f32[1,64], index: 7, kind: input, shape index: {}]   ;;  %s650_s8 = inlined_call_operand.<no memory space> [shape: f32[1], index: 8, kind: input, shape index: {}]   ;;  %s651_s9 = inlined_call_operand.vmem [shape: f32[16,1], index: 9, kind: output, shape index: {}]  }
   0x1   :  { %412 = vmatprep.subr.bf16.mxu0 %v481_v0  ;;  %v464_v1 = vld [vmem:[%s642_s2 + $0x38] sm:$0xff]   ;;  %428 = vmatprep.mubr.msk.bf16.mxu0 %vm482_vm0, %v481_v0  ;;  %v465_v4 = vld [vmem:[%s642_s2 + $0x30] sm:$0xff]   ;;  %v466_v5 = vld [vmem:[%s642_s2 + $0x28] sm:$0xff]   ;;  %v485_v14 = vmov 2   ;;  %v486_v17 = vmov 3   ;;  %vm352_vm1 = vcmask 523264  }
   0x2   :  { %459 = vset.pattern.permute.xlu1 %v483_v2  ;;  %458 = vset.pattern.permute.xlu0 %v484_v3  ;;  %v52_v6 = vld [vmem:[%s643_s1] sm:$0xff]  ;;  %v473_v8 = vld [vmem:[%s645_s5 + $0x38] sm:$0xff]   ;;  %v53_v9 = vld [vmem:[%s643_s1 + $0x8] sm:$0xff]  ;;  %vm363_vm2 = vcmask 7168  }
   0x3   :  { %413 = vmatpush3.bf16.msra.mxu0 %v464_v1  ;;  %432 = vmatprep.subr.bf16.mxu1 %v481_v0  ;;  %v467_v7 = vld [vmem:[%s642_s2 + $0x20] sm:$0xff]   ;;  %v474_v10 = vld [vmem:[%s645_s5 + $0x30] sm:$0xff]   ;;  %v468_v11 = vld [vmem:[%s642_s2 + $0x18] sm:$0xff]  }
   0x4   :  { %414 = vmatprep.subr.bf16.mxu0 %v481_v0  ;;  %448 = vmatprep.mubr.msk.bf16.mxu1 %vm482_vm0, %v481_v0  ;;  %v475_v12 = vld [vmem:[%s645_s5 + $0x28] sm:$0xff]   ;;  %v469_v13 = vld [vmem:[%s642_s2 + $0x10] sm:$0xff]   ;;  %v476_v15 = vld [vmem:[%s645_s5 + $0x20] sm:$0xff]  }
   0x5   :  { %168 = vperm.xlu1 %459, %v52_v6   ;;  %57 = vperm.xlu0 %458, %v52_v6   ;;  %v470_v16 = vld [vmem:[%s642_s2 + $0x8] sm:$0xff]   ;;  %v471_v18 = vld [vmem:[%s642_s2] sm:$0xff]   ;;  %v477_v20 = vld [vmem:[%s645_s5 + $0x18] sm:$0xff]  }
   0x6   :  { %433 = vmatpush3.bf16.msra.mxu1 %v473_v8  ;;  %v472_v19 = vld [vmem:[%s644_s0] sm:$0xff]   ;;  %v478_v21 = vld [vmem:[%s645_s5 + $0x10] sm:$0xff]   ;;  %v479_v22 = vld [vmem:[%s645_s5 + $0x8] sm:$0xff]  }
   0x7   :  { %415 = vmatpush3.bf16.msra.mxu0 %v465_v4  ;;  %434 = vmatprep.subr.bf16.mxu1 %v481_v0  ;;  %v480_v23 = vld [vmem:[%s645_s5] sm:$0xff]  }
   0x8   :  { %416 = vmatprep.subr.bf16.mxu0 %v481_v0  ;;  %v370_v29 = vld [vmem:[%s646_s3] ss:$0 sm:$0xff]  ;;  %v380_v30 = vld [vmem:[%s646_s3 + $0x1] ss:$0 sm:$0xff]  ;;  %v381_v31 = vld [vmem:[%s646_s3 + $0x2] ss:$0 sm:$0xff] }
   0x9   :  { %172 = vperm.xlu1 %459, %v53_v9   ;;  %62 = vperm.xlu0 %458, %v53_v9   ;;  %v382_v35 = vld [vmem:[%s646_s3 + $0x3] ss:$0 sm:$0xff]  ;;  %v383_v54 = vld [vmem:[%s647_s4] ss:$0 sm:$0xff] }
   0xa   :  { %435 = vmatpush3.bf16.msra.mxu1 %v474_v10  ;;  %v384_v62 = vld [vmem:[%s648_s6] ss:$0 sm:$0xff] }
   0xb   :  { %417 = vmatpush3.bf16.msra.mxu0 %v466_v5  ;;  %436 = vmatprep.subr.bf16.mxu1 %v481_v0  ;;  %v393_v2 = vld [vmem:[%s649_s7] ss:$0 sm:$0xff] }
   0xc   :  { %418 = vmatprep.subr.bf16.mxu0 %v481_v0 }
   0xd   :  { %461 = vset.pattern.permute.xlu1 %v485_v14  ;;  %460 = vset.pattern.permute.xlu0 %v485_v14 }
   0xe   :  { %189 = vperm.xlu1 %461, %v53_v9   ;;  %437 = vmatpush3.bf16.msra.mxu1 %v475_v12  ;;  %v360_v12 = vstv %s650_s8 }
   0xf   :  { %419 = vmatpush3.bf16.msra.mxu0 %v467_v7  ;;  %185 = vperm.xlu0 %460, %v52_v6  }
  0x10   :  { %420 = vmatprep.subr.bf16.mxu0 %v481_v0  ;;  %438 = vmatprep.subr.bf16.mxu1 %v481_v0 }
  0x12   :  { %462 = vset.pattern.permute.xlu1 %v486_v17  ;;  %439 = vmatpush3.bf16.msra.mxu1 %v476_v15 }
  0x13   :  { %421 = vmatpush3.bf16.msra.mxu0 %v468_v11  ;;  %202 = vperm.xlu1 %462, %v52_v6  }
  0x14   :  { %422 = vmatprep.subr.bf16.mxu0 %v481_v0  ;;  %463 = vset.pattern.permute.xlu0 %v486_v17 }
  0x15   :  { %440 = vmatprep.subr.bf16.mxu1 %v481_v0  ;;  %206 = vperm.xlu0 %463, %v53_v9  }
  0x16   :  { %441 = vmatpush3.bf16.msra.mxu1 %v477_v20 }
  0x17   :  { %423 = vmatpush3.bf16.msra.mxu0 %v469_v13  ;;  %442 = vmatprep.subr.bf16.mxu1 %v481_v0 }
  0x18   :  { %424 = vmatprep.subr.bf16.mxu0 %v481_v0 }
  0x1a   :  { %443 = vmatpush3.bf16.msra.mxu1 %v478_v21 }
  0x1b   :  { %425 = vmatpush3.bf16.msra.mxu0 %v470_v16  ;;  %444 = vmatprep.subr.bf16.mxu1 %v481_v0 }
  0x1c   :  { %426 = vmatprep.subr.bf16.mxu0 %v481_v0 }
  0x1e   :  { %445 = vmatpush3.bf16.msra.mxu1 %v479_v22 }
  0x1f   :  { %427 = vmatpush3.bf16.msra.mxu0 %v471_v18  ;;  %446 = vmatprep.subr.bf16.mxu1 %v481_v0 }
  0x22   :  { %429 = vmatmul.mubr.bf16.vlgmr.msra.gmra.mxu0 %v472_v19  ;;  %447 = vmatpush3.bf16.msra.mxu1 %v480_v23 }
  0x80   :  { %v169_v24 = vpop.permute.xlu1 %168  ;;  %v58_v25 = vpop.permute.xlu0 %57 }
  0x81   :  { %v69_v33 = vmul.f32 %v370_v29, %v58_v25  ;;  %v179_v37 = vmul.f32 %v380_v30, %v169_v24 }
  0x84   :  { %v173_v26 = vpop.permute.xlu1 %172  ;;  %v63_v27 = vpop.permute.xlu0 %62 }
  0x85   :  { %v70_v41 = vmul.f32 %v370_v29, %v63_v27  ;;  %v180_v46 = vmul.f32 %v380_v30, %v173_v26 }
  0x89   :  { %v190_v28 = vpop.permute.xlu1 %189 }
  0x8a   :  { %v186_v32 = vpop.permute.xlu0 %185  ;;  %v197_v50 = vmul.f32 %v381_v31, %v190_v28 }
  0x8b   :  { %v196_v39 = vmul.f32 %v381_v31, %v186_v32 }
  0x8e   :  { %v203_v36 = vpop.permute.xlu1 %202 }
  0x8f   :  { %v213_v43 = vmul.f32 %v382_v35, %v203_v36 }
  0x90   :  { %v207_v45 = vpop.permute.xlu0 %206 }
  0x91   :  { %v214_v53 = vmul.f32 %v382_v35, %v207_v45 }
  0xe2   :  { %v159_v34 = vpop.f32.mrf.mxu0 }
  0xe3   :  { %v160_v38 = vadd.f32 %v159_v34, %v69_v33 }
  0xe4   :  { %v430_v40 = vpop.f32.mrf.mxu0 }
  0xe5   :  { %v181_v42 = vadd.f32 %v179_v37, %v160_v38 }
  0xe6   :  { %v162_v44 = vpop.f32.mrf.mxu0 }
  0xe7   :  { %v198_v47 = vadd.f32 %v196_v39, %v181_v42  ;;  %v163_v48 = vadd.f32 %v162_v44, %v70_v41 }
  0xe8   :  { %v431_v49 = vpop.f32.mrf.mxu0 }
  0xe9   :  { %v215_v51 = vadd.f32 %v213_v43, %v198_v47  ;;  %v182_v52 = vadd.f32 %v180_v46, %v163_v48 }
  0xeb   :  { %v199_v55 = vadd.f32 %v197_v50, %v182_v52  ;;  %v224_v56 = vadd.f32 %v383_v54, %v215_v51 }
  0xed   :  { %v216_v57 = vadd.f32 %v214_v53, %v199_v55  ;;  %v226_v59 = vmax.f32 %v224_v56, 0.0 }
  0xef   :  { %v225_v58 = vadd.f32 %v383_v54, %v216_v57 }
  0xf1   :  { %v227_v60 = vmax.f32 %v225_v58, 0.0 }
  0xf3   :  { %v228_v61 = vpack.c.bf16 %v227_v60, %v226_v59 }
  0xf5   :  { %449 = vmatmul.mubr.bf16.vlgmr.msra.gmra.mxu1 %v228_v61 }
 0x1b5   :  { %v334_v63 = vpop.f32.mrf.mxu1 }
 0x1b6   :  { %v335_v0 = vadd.f32 %v384_v62, %v334_v63 }
 0x1b7   :  { %v450_v1 = vpop.f32.mrf.mxu1 }
 0x1b8   :  { %v341_v3 = vmax.f32 %v335_v0, 0.0 }
 0x1b9   :  { %v337_v4 = vpop.f32.mrf.mxu1 }
 0x1ba   :  { %v338_v5 = vadd.f32 %v384_v62, %v337_v4  ;;  %v350_v6 = vmul.f32 %v393_v2, %v341_v3 }
 0x1bb   :  { %v451_v7 = vpop.f32.mrf.mxu1 }
 0x1bc   :  { %v342_v8 = vmax.f32 %v338_v5, 0.0  ;;  %v353_v9 = vsel %vm352_vm1, %v350_v6, 0.0 }
 0x1bd   :  { %354 = vadd.xlane.f32.xlu1 %v353_v9 }
 0x1be   :  { %v351_v10 = vmul.f32 %v393_v2, %v342_v8 }
 0x1c0   :  { %v356_v11 = vsel %vm352_vm1, %v351_v10, 0.0 }
 0x1c1   :  { %357 = vadd.xlane.f32.xlu0 %v356_v11 }
 0x246   :  { %v355_v13 = vpop.xlane.xlu1 %354 }
 0x247   :  { %v361_v14 = vadd.f32 %v360_v12, %v355_v13 }
 0x249   :  { %364 = vst.msk [vmem:[%s651_s9] sm:$0xff] %vm363_vm2, %v361_v14 }
 0x24a   :  { %v358_v15 = vpop.xlane.xlu0 %357 }
 0x24b   :  { %v362_v16 = vadd.f32 %v360_v12, %v358_v15 }
 0x24d   :  { %365 = vst.msk [vmem:[%s651_s9 + $0x8] sm:$0xff] %vm363_vm2, %v362_v16 }

</bundles_post_ra>
